<compile_context>
chip_gen: v5e
topology: v5e:2x2
jax: 0.10.0
libtpu: 0.0.40
codegen_flags: <defaults>
</compile_context>

<pallas_src>
import jax
import jax.numpy as jnp
from jax.experimental import pallas as pl
from jax.experimental.pallas import tpu as pltpu

# Packed-output lane layout: [ x1 (64) | x2 (32) | x3 (16) | y (1) | pad (15) ]
_X1_OFF, _X1_W = 0, 64
_X2_OFF, _X2_W = 64, 32
_X3_OFF, _X3_W = 96, 16
_Y_OFF, _Y_W = 112, 1
_PACK_W = 128


def mlp_kernel(x_ref,
               w1_ref, b1_ref,
               w2_ref, b2_ref,
               w3_ref, b3_ref,
               w4r_ref, b4_ref,
               packed_ref):
    x = x_ref[...]

    # fc1 + relu (MXU, f32 accumulation)
    h1 = jnp.maximum(
        jnp.dot(x, w1_ref[...], preferred_element_type=jnp.float32) + b1_ref[...],
        0.0)
    # fc2 + relu
    h2 = jnp.maximum(
        jnp.dot(h1, w2_ref[...], preferred_element_type=jnp.float32) + b2_ref[...],
        0.0)
    # fc3 + relu
    h3 = jnp.maximum(
        jnp.dot(h2, w3_ref[...], preferred_element_type=jnp.float32) + b3_ref[...],
        0.0)

    # fc4: per-row dot of length 16 -> broadcast multiply + lane reduction on
    # the VPU/XLU (a 1-lane-wide MXU result tile would be pure drain overhead).
    y = jnp.sum(h3 * w4r_ref[...], axis=-1, keepdims=True) + b4_ref[...]

    # Single lane-dense (tile, 128) write: [x1 | x2 | x3 | y | zero pad].
    pad = jnp.zeros((h1.shape[0], _PACK_W - (_Y_OFF + _Y_W)), dtype=jnp.float32)
    packed_ref[...] = jnp.concatenate([h1, h2, h3, y, pad], axis=-1)


def mainnet_forward(x, params, *, batch_tile=512):
    """x: (B, 8) float32.

    params: [(w1,b1),(w2,b2),(w3,b3),(w4,b4)] with weights stored transposed
    as (in_features, out_features) and biases as (1, out_features).

    Returns (out, [x1, x2, x3]) matching the PyTorch module.
    """
    (w1, b1), (w2, b2), (w3, b3), (w4, b4) = params

    B, D_in = x.shape
    assert D_in == 8

    # fc4 weight as a (1, 16) row vector for the VPU dot product.
    w4_row = w4.reshape(1, 16)
    b4_2d = b4.reshape(1, 1)

    # Pick a batch tile: multiple of 8 (sublane), as large as requested but
    # never larger than the (rounded-up) batch.
    b_rounded = ((B + 7) // 8) * 8
    tile = min(batch_tile, b_rounded)
    tile = max(8, (tile // 8) * 8)

    grid_len = pl.cdiv(B, tile)          # tail handled via padding, no assert
    b_pad = grid_len * tile
    if b_pad != B:
        x = jnp.pad(x, ((0, b_pad - B), (0, 0)))

    full_map = lambda i: (0, 0)          # constant block index -> weights stay
    weight_spec = lambda a: pl.BlockSpec(a.shape, full_map)  # resident in VMEM

    # Scoped-VMEM estimate: double-buffered input + packed output blocks
    # (lane-padded to 128) plus ~1 MiB slack for the resident weights.
    vmem_need = 2 * 2 * tile * _PACK_W * 4 + (1 << 20)
    cp_kwargs = dict(dimension_semantics=("parallel",))
    if vmem_need > 16 * 1024 * 1024:
        cp_kwargs["vmem_limit_bytes"] = vmem_need

    packed = pl.pallas_call(
        mlp_kernel,
        out_shape=jax.ShapeDtypeStruct((b_pad, _PACK_W), jnp.float32),
        grid_spec=pltpu.PrefetchScalarGridSpec(
            num_scalar_prefetch=0,
            grid=(grid_len,),
            in_specs=[
                pl.BlockSpec((tile, 8), lambda i: (i, 0)),
                weight_spec(w1), weight_spec(b1),
                weight_spec(w2), weight_spec(b2),
                weight_spec(w3), weight_spec(b3),
                weight_spec(w4_row), weight_spec(b4_2d),
            ],
            out_specs=pl.BlockSpec((tile, _PACK_W), lambda i: (i, 0)),
        ),
        compiler_params=pltpu.CompilerParams(**cp_kwargs),
    )(x, w1, b1, w2, b2, w3, b3, w4_row, b4_2d)

    x1 = packed[:B, _X1_OFF:_X1_OFF + _X1_W]
    x2 = packed[:B, _X2_OFF:_X2_OFF + _X2_W]
    x3 = packed[:B, _X3_OFF:_X3_OFF + _X3_W]
    out = packed[:B, _Y_OFF:_Y_OFF + _Y_W]
    return out, [x1, x2, x3]


def init_params(key):
    """Deterministic init mimicking nn.Linear's uniform(-1/sqrt(fan_in), ...).

    Weights stored transposed: (in_features, out_features).
    Biases stored as (1, out_features).
    """
    dims = [(8, 64), (64, 32), (32, 16), (16, 1)]
    params = []
    for fan_in, fan_out in dims:
        key, kw, kb = jax.random.split(key, 3)
        bound = 1.0 / jnp.sqrt(fan_in)
        w = jax.random.uniform(kw, (fan_in, fan_out), jnp.float32, -bound, bound)
        b = jax.random.uniform(kb, (1, fan_out), jnp.float32, -bound, bound)
        params.append((w, b))
    return params


def reference_forward(x, params):
    (w1, b1), (w2, b2), (w3, b3), (w4, b4) = params
    x1 = jnp.maximum(x @ w1 + b1, 0.0)
    x2 = jnp.maximum(x1 @ w2 + b2, 0.0)
    x3 = jnp.maximum(x2 @ w3 + b3, 0.0)
    y = x3 @ w4 + b4
    return y, [x1, x2, x3]


if __name__ == "__main__":
    key = jax.random.PRNGKey(0)
    key, kx = jax.random.split(key)

    # Small batch; deliberately NOT a multiple of 8 to exercise tail padding.
    B = 19
    x = jax.random.normal(kx, (B, 8), jnp.float32)
    params = init_params(key)

    out, (x1, x2, x3) = mainnet_forward(x, params)
    out = jax.block_until_ready(out)
    x1 = jax.block_until_ready(x1)
    x2 = jax.block_until_ready(x2)
    x3 = jax.block_until_ready(x3)

    # correctness check against pure-JAX reference
    ref_out, (rx1, rx2, rx3) = reference_forward(x, params)
    assert out.shape == (B, 1) and x1.shape == (B, 64)
    assert x2.shape == (B, 32) and x3.shape == (B, 16)
    assert jnp.allclose(out, ref_out, atol=1e-5), "final output mismatch"
    assert jnp.allclose(x1, rx1, atol=1e-5), "x1 mismatch"
    assert jnp.allclose(x2, rx2, atol=1e-5), "x2 mismatch"
    assert jnp.allclose(x3, rx3, atol=1e-5), "x3 mismatch"

    print("KERNEL_OK")
</pallas_src>

<mosaic_0001>
module attributes {stable_mosaic.version = 11 : i64} {
  func.func @mlp_kernel(%arg0: i32, %arg1: memref<24x8xf32, #tpu.memory_space<vmem>>, %arg2: memref<8x64xf32, #tpu.memory_space<vmem>>, %arg3: memref<1x64xf32, #tpu.memory_space<vmem>>, %arg4: memref<64x32xf32, #tpu.memory_space<vmem>>, %arg5: memref<1x32xf32, #tpu.memory_space<vmem>>, %arg6: memref<32x16xf32, #tpu.memory_space<vmem>>, %arg7: memref<1x16xf32, #tpu.memory_space<vmem>>, %arg8: memref<1x16xf32, #tpu.memory_space<vmem>>, %arg9: memref<1x1xf32, #tpu.memory_space<vmem>>, %arg10: memref<24x128xf32, #tpu.memory_space<vmem>>) attributes {dimension_semantics = [#tpu.dimension_semantics<parallel>], iteration_bounds = array<i64: 1>, scalar_prefetch = 0 : i64, scratch_operands = 0 : i64, tpu.core_type = #tpu.core_type<tc>, window_params = [{transform_indices = @transform_0, window_bounds = array<i64: 24, 8>}, {pipeline_mode = #tpu.pipeline_mode<synchronous>, transform_indices = @transform_1, window_bounds = array<i64: 8, 64>}, {pipeline_mode = #tpu.pipeline_mode<synchronous>, transform_indices = @transform_2, window_bounds = array<i64: 1, 64>}, {pipeline_mode = #tpu.pipeline_mode<synchronous>, transform_indices = @transform_3, window_bounds = array<i64: 64, 32>}, {pipeline_mode = #tpu.pipeline_mode<synchronous>, transform_indices = @transform_4, window_bounds = array<i64: 1, 32>}, {pipeline_mode = #tpu.pipeline_mode<synchronous>, transform_indices = @transform_5, window_bounds = array<i64: 32, 16>}, {pipeline_mode = #tpu.pipeline_mode<synchronous>, transform_indices = @transform_6, window_bounds = array<i64: 1, 16>}, {pipeline_mode = #tpu.pipeline_mode<synchronous>, transform_indices = @transform_7, window_bounds = array<i64: 1, 16>}, {pipeline_mode = #tpu.pipeline_mode<synchronous>, transform_indices = @transform_8, window_bounds = array<i64: 1, 1>}, {transform_indices = @transform_9, window_bounds = array<i64: 24, 128>}]} {
    %c0 = arith.constant 0 : index
    %c0_0 = arith.constant 0 : index
    %0 = vector.load %arg1[%c0, %c0_0] : memref<24x8xf32, #tpu.memory_space<vmem>>, vector<24x8xf32>
    %c0_1 = arith.constant 0 : index
    %c0_2 = arith.constant 0 : index
    %1 = vector.load %arg2[%c0_1, %c0_2] : memref<8x64xf32, #tpu.memory_space<vmem>>, vector<8x64xf32>
    %cst = arith.constant dense<0.000000e+00> : vector<24x64xf32>
    %2 = tpu.matmul %0, %1, %cst {dimension_numbers = #tpu.dot_dimension_numbers<[1], [0], [0], [1], [0, 0, 1, 1], [], []>} : vector<24x8xf32>, vector<8x64xf32>, vector<24x64xf32> -> vector<24x64xf32>
    %c0_3 = arith.constant 0 : index
    %c0_4 = arith.constant 0 : index
    %3 = vector.load %arg3[%c0_3, %c0_4] : memref<1x64xf32, #tpu.memory_space<vmem>>, vector<1x64xf32>
    %4 = vector.broadcast %3 : vector<1x64xf32> to vector<24x64xf32>
    %5 = arith.addf %2, %4 : vector<24x64xf32>
    %cst_5 = arith.constant 0.000000e+00 : f32
    %6 = vector.broadcast %cst_5 : f32 to vector<24x64xf32>
    %7 = arith.maximumf %5, %6 : vector<24x64xf32>
    %c0_6 = arith.constant 0 : index
    %c0_7 = arith.constant 0 : index
    %8 = vector.load %arg4[%c0_6, %c0_7] : memref<64x32xf32, #tpu.memory_space<vmem>>, vector<64x32xf32>
    %cst_8 = arith.constant dense<0.000000e+00> : vector<24x32xf32>
    %9 = tpu.matmul %7, %8, %cst_8 {dimension_numbers = #tpu.dot_dimension_numbers<[1], [0], [0], [1], [0, 0, 1, 1], [], []>} : vector<24x64xf32>, vector<64x32xf32>, vector<24x32xf32> -> vector<24x32xf32>
    %c0_9 = arith.constant 0 : index
    %c0_10 = arith.constant 0 : index
    %10 = vector.load %arg5[%c0_9, %c0_10] : memref<1x32xf32, #tpu.memory_space<vmem>>, vector<1x32xf32>
    %11 = vector.broadcast %10 : vector<1x32xf32> to vector<24x32xf32>
    %12 = arith.addf %9, %11 : vector<24x32xf32>
    %cst_11 = arith.constant 0.000000e+00 : f32
    %13 = vector.broadcast %cst_11 : f32 to vector<24x32xf32>
    %14 = arith.maximumf %12, %13 : vector<24x32xf32>
    %c0_12 = arith.constant 0 : index
    %c0_13 = arith.constant 0 : index
    %15 = vector.load %arg6[%c0_12, %c0_13] : memref<32x16xf32, #tpu.memory_space<vmem>>, vector<32x16xf32>
    %cst_14 = arith.constant dense<0.000000e+00> : vector<24x16xf32>
    %16 = tpu.matmul %14, %15, %cst_14 {dimension_numbers = #tpu.dot_dimension_numbers<[1], [0], [0], [1], [0, 0, 1, 1], [], []>} : vector<24x32xf32>, vector<32x16xf32>, vector<24x16xf32> -> vector<24x16xf32>
    %c0_15 = arith.constant 0 : index
    %c0_16 = arith.constant 0 : index
    %17 = vector.load %arg7[%c0_15, %c0_16] : memref<1x16xf32, #tpu.memory_space<vmem>>, vector<1x16xf32>
    %18 = vector.broadcast %17 : vector<1x16xf32> to vector<24x16xf32>
    %19 = arith.addf %16, %18 : vector<24x16xf32>
    %cst_17 = arith.constant 0.000000e+00 : f32
    %20 = vector.broadcast %cst_17 : f32 to vector<24x16xf32>
    %21 = arith.maximumf %19, %20 : vector<24x16xf32>
    %c0_18 = arith.constant 0 : index
    %c0_19 = arith.constant 0 : index
    %22 = vector.load %arg8[%c0_18, %c0_19] : memref<1x16xf32, #tpu.memory_space<vmem>>, vector<1x16xf32>
    %23 = vector.broadcast %22 : vector<1x16xf32> to vector<24x16xf32>
    %24 = arith.mulf %21, %23 : vector<24x16xf32>
    %cst_20 = arith.constant dense<0.000000e+00> : vector<24xf32>
    %25 = vector.multi_reduction <add>, %24, %cst_20 [1] : vector<24x16xf32> to vector<24xf32>
    %26 = vector.shape_cast %25 : vector<24xf32> to vector<24x1xf32>
    %c0_21 = arith.constant 0 : index
    %c0_22 = arith.constant 0 : index
    %27 = vector.load %arg9[%c0_21, %c0_22] : memref<1x1xf32, #tpu.memory_space<vmem>>, vector<1x1xf32>
    %28 = vector.broadcast %27 : vector<1x1xf32> to vector<24x1xf32>
    %29 = arith.addf %26, %28 : vector<24x1xf32>
    %cst_23 = arith.constant 0.000000e+00 : f32
    %30 = vector.broadcast %cst_23 : f32 to vector<24x15xf32>
    %31 = tpu.concatenate %7, %14, %21, %29, %30 in 1 : vector<24x64xf32>, vector<24x32xf32>, vector<24x16xf32>, vector<24x1xf32>, vector<24x15xf32> -> vector<24x128xf32>
    %c0_24 = arith.constant 0 : index
    %c0_25 = arith.constant 0 : index
    %32 = vector.load %arg10[%c0_24, %c0_25] : memref<24x128xf32, #tpu.memory_space<vmem>>, vector<24x128xf32>
    tpu.vector_store %arg10[%c0_24, %c0_25], %31 {strides = array<i32>} : memref<24x128xf32, #tpu.memory_space<vmem>>, vector<24x128xf32>,
    return
  }
  func.func @transform_0(%arg0: i32) -> (i32, i32) {
    %c0_i32 = arith.constant 0 : i32
    %c0_i32_0 = arith.constant 0 : i32
    return %arg0, %c0_i32 : i32, i32
  }
  func.func @transform_1(%arg0: i32) -> (i32, i32) {
    %c0_i32 = arith.constant 0 : i32
    %c0_i32_0 = arith.constant 0 : i32
    %c0_i32_1 = arith.constant 0 : i32
    return %c0_i32, %c0_i32_0 : i32, i32
  }
  func.func @transform_2(%arg0: i32) -> (i32, i32) {
    %c0_i32 = arith.constant 0 : i32
    %c0_i32_0 = arith.constant 0 : i32
    %c0_i32_1 = arith.constant 0 : i32
    return %c0_i32, %c0_i32_0 : i32, i32
  }
  func.func @transform_3(%arg0: i32) -> (i32, i32) {
    %c0_i32 = arith.constant 0 : i32
    %c0_i32_0 = arith.constant 0 : i32
    %c0_i32_1 = arith.constant 0 : i32
    return %c0_i32, %c0_i32_0 : i32, i32
  }
  func.func @transform_4(%arg0: i32) -> (i32, i32) {
    %c0_i32 = arith.constant 0 : i32
    %c0_i32_0 = arith.constant 0 : i32
    %c0_i32_1 = arith.constant 0 : i32
    return %c0_i32, %c0_i32_0 : i32, i32
  }
  func.func @transform_5(%arg0: i32) -> (i32, i32) {
    %c0_i32 = arith.constant 0 : i32
    %c0_i32_0 = arith.constant 0 : i32
    %c0_i32_1 = arith.constant 0 : i32
    return %c0_i32, %c0_i32_0 : i32, i32
  }
  func.func @transform_6(%arg0: i32) -> (i32, i32) {
    %c0_i32 = arith.constant 0 : i32
    %c0_i32_0 = arith.constant 0 : i32
    %c0_i32_1 = arith.constant 0 : i32
    return %c0_i32, %c0_i32_0 : i32, i32
  }
  func.func @transform_7(%arg0: i32) -> (i32, i32) {
    %c0_i32 = arith.constant 0 : i32
    %c0_i32_0 = arith.constant 0 : i32
    %c0_i32_1 = arith.constant 0 : i32
    return %c0_i32, %c0_i32_0 : i32, i32
  }
  func.func @transform_8(%arg0: i32) -> (i32, i32) {
    %c0_i32 = arith.constant 0 : i32
    %c0_i32_0 = arith.constant 0 : i32
    %c0_i32_1 = arith.constant 0 : i32
    return %c0_i32, %c0_i32_0 : i32, i32
  }
  func.func @transform_9(%arg0: i32) -> (i32, i32) {
    %c0_i32 = arith.constant 0 : i32
    %c0_i32_0 = arith.constant 0 : i32
    return %arg0, %c0_i32 : i32, i32
  }
}

</mosaic_0001>

<bundles_post_ra>
// kernel: tpu_custom_call.1
= control target key start
LH: loop header
LB: loop body
LE: loop exit
PB: predicated region body
PF: predicated region fallthrough
CT: control target
= control target key end

     0   :  { %s488_s0 = inlined_call_operand.vmem [shape: f32[24,8], index: 0, kind: input, shape index: {}]   ;;  %s489_s1 = inlined_call_operand.vmem [shape: f32[8,64], index: 1, kind: input, shape index: {}]   ;;  %s490_s2 = inlined_call_operand.vmem [shape: f32[1,64], index: 2, kind: input, shape index: {}]   ;;  %s491_s3 = inlined_call_operand.vmem [shape: f32[64,32], index: 3, kind: input, shape index: {}]   ;;  %s492_s4 = inlined_call_operand.vmem [shape: f32[1,32], index: 4, kind: input, shape index: {}]   ;;  %s493_s5 = inlined_call_operand.vmem [shape: f32[32,16], index: 5, kind: input, shape index: {}]   ;;  %s494_s6 = inlined_call_operand.vmem [shape: f32[1,16], index: 6, kind: input, shape index: {}]   ;;  %s495_s7 = inlined_call_operand.vmem [shape: f32[1,16], index: 7, kind: input, shape index: {}]   ;;  %s496_s8 = inlined_call_operand.<no memory space> [shape: f32[1,1], index: 8, kind: input, shape index: {}]   ;;  %s497_s9 = inlined_call_operand.hbm [shape: f32[24,128], index: 9, kind: output, shape index: {}]  }
   0x1   :  { %v14_v0 = vstv %s496_s8 }
   0x2   :  { %15 = vst [vmem:[#allocation2] sm:$0x1] %v14_v0 }
   0x3   :  { %v38_v1 = vld [vmem:[%s489_s1] sm:$0xff]  ;;  %vm43_vm0 = vcmask 64512   ;;  %v89_v3 = vld [vmem:[%s491_s3 + $0x38] sm:$0xff]  ;;  %v88_v4 = vld [vmem:[%s491_s3 + $0x30] sm:$0xff] }
   0x4   :  { %v35_v2 = vld [vmem:[%s488_s0] sm:$0xff]  ;;  %68 = vmatpush.msra.mxu0 %v38_v1  ;;  %112 = vmatpush.msra.mxu1 %v89_v3  ;;  %v87_v5 = vld [vmem:[%s491_s3 + $0x28] sm:$0xff] }
   0x5   :  { %273 = vmatmul.msk.f32.vlgmr.msra.gmra.mxu0 %vm43_vm0, %v35_v2  ;;  %282 = vmatpush.msra.mxu3 %v89_v3  ;;  %v86_v6 = vld [vmem:[%s491_s3 + $0x20] sm:$0xff] }
   0x6   :  { %113 = vmatpush.msra.mxu1 %v88_v4 }
   0x7   :  { %283 = vmatpush.msra.mxu3 %v88_v4 }
   0x8   :  { %16 = vsyncpa [#allocation4], 0  ;;  %114 = vmatpush.msra.mxu1 %v87_v5  ;;  %v36_v7 = vld [vmem:[%s488_s0 + $0x8] sm:$0xff]  ;;  %v85_v8 = vld [vmem:[%s491_s3 + $0x18] sm:$0xff]  ;;  %vm94_vm1 = vcmask 523264   ;;  %vm141_vm2 = vcmask 261120  }
   0x9   :  { %284 = vmatpush.msra.mxu3 %v87_v5  ;;  %v37_v9 = vld [vmem:[%s488_s0 + $0x10] sm:$0xff]  ;;  %v83_v11 = vld [vmem:[%s491_s3 + $0x8] sm:$0xff]  ;;  %v82_v12 = vld [vmem:[%s491_s3] sm:$0xff]  ;;  %s327_s1 = smov 64   ;;  %vm187_vm3 = vcmask 130048   ;;  %vm244_vm4 = vcmask 916480  }
   0xa   :  { %115 = vmatpush.msra.mxu1 %v86_v6  ;;  %v84_v10 = vld [vmem:[%s491_s3 + $0x10] sm:$0xff]  ;;  %v136_v13 = vld [vmem:[%s493_s5 + $0x18] sm:$0xff]  ;;  %v296_v14 = vld [vmem:[%s490_s2] ss:$0 sm:$0xff]  ;;  %vm240_vm5 = vcmask 785408   ;;  %vm248_vm6 = vcmask 924672  }
   0xb   :  { %285 = vmatpush.msra.mxu3 %v86_v6  ;;  %163 = vmatpush.msra.mxu2 %v136_v13  ;;  %v135_v24 = vld [vmem:[%s493_s5 + $0x10] sm:$0xff]  ;;  %v134_v25 = vld [vmem:[%s493_s5 + $0x8] sm:$0xff]  ;;  %v133_v26 = vld [vmem:[%s493_s5] sm:$0xff]  ;;  %s261_s26 = sshll.u32 %s497_s9, 4  ;;  %s331_s27 = smov 128   ;;  %s262_s26 = int_to_ptr.hbm [resolvable:$true] %s261_s26 }
   0xc   :  { %116 = vmatpush.msra.mxu1 %v85_v8  ;;  %v297_v27 = vld [vmem:[%s492_s4] ss:$0 sm:$0xff]  ;;  %s328_s4 = smov 96   ;;  %s332_s28 = smov 8  }
   0xd   :  { %274 = vmatmul.msk.f32.gmra.mxu0 %vm43_vm0, %v36_v7  ;;  %286 = vmatpush.msra.mxu3 %v85_v8  ;;  %v298_v37 = vld [vmem:[%s494_s6] ss:$0 sm:$0xff]  ;;  %s329_s6 = smov 112  }
   0xe   :  { %117 = vmatpush.msra.mxu1 %v84_v10  ;;  %164 = vmatpush.msra.mxu2 %v135_v24  ;;  %v299_v47 = vld [vmem:[%s495_s7] ss:$0 sm:$0xff]  ;;  %s330_s7 = smov [#allocation3]  }
   0xf   :  { %287 = vmatpush.msra.mxu3 %v84_v10  ;;  %v300_v55 = vld [vmem:[#allocation2] ss:$0 sm:$0xff]  ;;  %s259_s23 = sshll.u32 %s330_s7, 4  ;;  %s260_s23 = int_to_ptr.vmem [resolvable:$true] %s259_s23 }
  0x10   :  { %118 = vmatpush.msra.mxu1 %v83_v11  ;;  %165 = vmatpush.msra.mxu2 %v134_v25 }
  0x11   :  { %288 = vmatpush.msra.mxu3 %v83_v11 }
  0x12   :  { %119 = vmatpush.msra.mxu1 %v82_v12  ;;  %166 = vmatpush.msra.mxu2 %v133_v26 }
  0x13   :  { %289 = vmatpush.msra.mxu3 %v82_v12 }
  0x15   :  { %275 = vmatmul.msk.f32.gmra.mxu0 %vm43_vm0, %v37_v9 }
  0x82   :  { %v70_v15 = vpop.f32.mrf.mxu0 }
  0x83   :  { %v431_v16 = vadd.f32 %v296_v14, %v70_v15 }
  0x85   :  { %v79_v17 = vmax.f32 %v431_v16, 0.0 }
  0x87   :  { %276 = vmatmul.msk.f32.vlgmr.msra.gmra.mxu1 %vm94_vm1, %v79_v17 }
  0x8a   :  { %v73_v18 = vpop.f32.mrf.mxu0 }
  0x8b   :  { %v437_v19 = vadd.f32 %v296_v14, %v73_v18 }
  0x8d   :  { %v80_v20 = vmax.f32 %v437_v19, 0.0 }
  0x8f   :  { %277 = vmatmul.msk.f32.vlgmr.msra.gmra.mxu3 %vm94_vm1, %v80_v20 }
  0x92   :  { %v76_v21 = vpop.f32.mrf.mxu0 }
  0x93   :  { %v443_v22 = vadd.f32 %v296_v14, %v76_v21 }
  0x95   :  { %v81_v23 = vmax.f32 %v443_v22, 0.0 }
  0x97   :  { %278 = vmatmul.msk.f32.gmra.mxu3 %vm94_vm1, %v81_v23 }
 0x104   :  { %v121_v28 = vpop.f32.mrf.mxu1 }
 0x105   :  { %v122_v29 = vadd.f32 %v297_v27, %v121_v28 }
 0x107   :  { %v130_v30 = vmax.f32 %v122_v29, 0.0 }
 0x109   :  { %204 = vrot.lane.b32.xlu1 %v130_v30, %s327_s1  ;;  %279 = vmatmul.msk.f32.vlgmr.msra.gmra.mxu2 %vm141_vm2, %v130_v30 }
 0x112   :  { %v124_v31 = vpop.f32.mrf.mxu3 }
 0x113   :  { %v125_v32 = vadd.f32 %v297_v27, %v124_v31 }
 0x115   :  { %v131_v33 = vmax.f32 %v125_v32, 0.0 }
 0x117   :  { %206 = vrot.lane.b32.xlu2 %v131_v33, %s327_s1  ;;  %280 = vmatmul.msk.f32.gmra.mxu2 %vm141_vm2, %v131_v33 }
 0x11a   :  { %v127_v34 = vpop.f32.mrf.mxu3 }
 0x11b   :  { %v128_v35 = vadd.f32 %v297_v27, %v127_v34 }
 0x11d   :  { %v132_v36 = vmax.f32 %v128_v35, 0.0 }
 0x11f   :  { %208 = vrot.lane.b32.xlu2 %v132_v36, %s327_s1  ;;  %281 = vmatmul.msk.f32.gmra.mxu2 %vm141_vm2, %v132_v36 }
 0x171   :  { %v207_v63 = vpop.permute.xlu2 %206 }
 0x172   :  { %v238_v13 = vsel %vm94_vm1, %v80_v20, %v207_v63 }
 0x179   :  { %v209_v0 = vpop.permute.xlu2 %208 }
 0x17a   :  { %v239_v8 = vsel %vm94_vm1, %v81_v23, %v209_v0 }
 0x17b   :  { %v205_v54 = vpop.permute.xlu1 %204 }
 0x17c   :  { %v237_v3 = vsel %vm94_vm1, %v79_v17, %v205_v54 }
 0x18c   :  { %v168_v38 = vpop.f32.mrf.mxu2 }
 0x18d   :  { %v169_v39 = vadd.f32 %v298_v37, %v168_v38 }
 0x18f   :  { %v177_v40 = vmax.f32 %v169_v39, 0.0 }
 0x191   :  { %216 = vrot.lane.b32.xlu0 %v177_v40, %s328_s4  ;;  %v184_v50 = vmul.f32 %v299_v47, %v177_v40 }
 0x193   :  { %v188_v51 = vsel %vm187_vm3, %v184_v50, 0.0 }
 0x19a   :  { %v171_v41 = vpop.f32.mrf.mxu2 }
 0x19b   :  { %v172_v42 = vadd.f32 %v298_v37, %v171_v41 }
 0x19d   :  { %v178_v43 = vmax.f32 %v172_v42, 0.0 }
 0x19f   :  { %218 = vrot.lane.b32.xlu2 %v178_v43, %s328_s4  ;;  %v185_v52 = vmul.f32 %v299_v47, %v178_v43 }
 0x1a1   :  { %v191_v53 = vsel %vm187_vm3, %v185_v52, 0.0 }
 0x1a2   :  { %v174_v44 = vpop.f32.mrf.mxu2 }
 0x1a3   :  { %v175_v45 = vadd.f32 %v298_v37, %v174_v44 }
 0x1a5   :  { %v179_v46 = vmax.f32 %v175_v45, 0.0 }
 0x1a7   :  { %220 = vrot.lane.b32.xlu2 %v179_v46, %s328_s4  ;;  %v186_v48 = vmul.f32 %v299_v47, %v179_v46 }
 0x1a9   :  { %v194_v49 = vsel %vm187_vm3, %v186_v48, 0.0 }
 0x1aa   :  { %195 = vadd.xlane.f32.xlu1 %v194_v49 }
 0x1bb   :  { %189 = vadd.xlane.f32.xlu0 %v188_v51 }
 0x1c3   :  { %192 = vadd.xlane.f32.xlu0 %v191_v53 }
 0x1f9   :  { %v219_v1 = vpop.permute.xlu2 %218 }
 0x1fa   :  { %v242_v14 = vsel %vm240_vm5, %v238_v13, %v219_v1 }
 0x201   :  { %v221_v2 = vpop.permute.xlu2 %220 }
 0x202   :  { %v243_v9 = vsel %vm240_vm5, %v239_v8, %v221_v2 }
 0x203   :  { %v217_v58 = vpop.permute.xlu0 %216 }
 0x204   :  { %v241_v4 = vsel %vm240_vm5, %v237_v3, %v217_v58 }
 0x21d   :  { %v196_v56 = vpop.xlane.xlu1 %195 }
 0x21e   :  { %v203_v57 = vadd.f32 %v300_v55, %v196_v56 }
 0x220   :  { %232 = vrot.lane.b32.xlu0 %v203_v57, %s329_s6 }
 0x22e   :  { %v190_v59 = vpop.xlane.xlu0 %189 }
 0x22f   :  { %v201_v60 = vadd.f32 %v300_v55, %v190_v59 }
 0x231   :  { %228 = vrot.lane.b32.xlu2 %v201_v60, %s329_s6 }
 0x236   :  { %v193_v61 = vpop.xlane.xlu0 %192 }
 0x237   :  { %v202_v62 = vadd.f32 %v300_v55, %v193_v61 }
 0x239   :  { %230 = vrot.lane.b32.xlu1 %v202_v62, %s329_s6 }
 0x28b   :  { %v229_v5 = vpop.permute.xlu2 %228 }
 0x28c   :  { %v245_v6 = vsel %vm244_vm4, %v241_v4, %v229_v5 }
 0x28d   :  { %v249_v7 = vsel %vm248_vm6, %v245_v6, 0.0 }
 0x28e   :  { %252 = vst [vmem:[#allocation3] sm:$0xff] %v249_v7 }
 0x292   :  { %v233_v10 = vpop.permute.xlu0 %232 }
 0x293   :  { %v247_v11 = vsel %vm244_vm4, %v243_v9, %v233_v10 }
 0x294   :  { %v251_v12 = vsel %vm248_vm6, %v247_v11, 0.0 }
 0x295   :  { %254 = vst [vmem:[#allocation3 + $0x10] sm:$0xff] %v251_v12 }
 0x2ab   :  { %v231_v15 = vpop.permute.xlu1 %230 }
 0x2ac   :  { %v246_v16 = vsel %vm244_vm4, %v242_v14, %v231_v15 }
 0x2ad   :  { %v250_v17 = vsel %vm248_vm6, %v246_v16, 0.0 }
 0x2ae   :  { %253 = vst [vmem:[#allocation3 + $0x8] sm:$0xff] %v250_v17 }
 0x2af   :  { %267 = dma.vmem_to_hbm [thread:$0]  %s260_s23, 384, %s262_s26, [#allocation4], %s331_s27, %s331_s27, %s332_s28  }
 0x2b0   :  { %325 = dma.done.wait [#allocation4], 384  }
 0x2b1   :  { %326 = vsyncadd [#allocation4], 4294966912 }
 0x2b2   :  { %272 = vsyncpa [#allocation4], 1 }

</bundles_post_ra>
